<compile_context>
chip_gen: v7x
topology: tpu7x:2x2x1
jax: 0.10.0
libtpu: 0.0.40
codegen_flags: <defaults>
</compile_context>

<pallas_src>
import jax
import jax.numpy as jnp
from jax import lax
from jax.experimental import pallas as pl
from jax.experimental.pallas import tpu as pltpu


def _round_up(x, m):
    return (x + m - 1) // m * m


def _cdiv(a, b):
    return -(-a // b)


def mlp_kernel(x_ref, w1_ref, b1_ref, w2_ref, b2_ref, o_ref):
    """Fused Linear(10->5) + ReLU + Linear(5->1), batch on the lane axis.

    x_ref : (TB, IN)   batch tile in its *natural* row-major layout (pipelined)
    w1_ref: (HID, IN)  fc1.weight, resident in VMEM
    b1_ref: (HID, 1)   fc1.bias,   resident
    w2_ref: (OUT, HID) fc2.weight, resident
    b2_ref: (OUT, 1)   fc2.bias,   resident
    o_ref : (OUT, TB)  lane-dense output tile
    """
    x = x_ref[...]                                           # (TB, IN)

    # fc1 as an NT contraction: contract the IN axis of both operands, i.e.
    # w1 @ x^T -> (HID, TB).  Same dot_general pattern as q@k^T in the TPU
    # flash-attention kernels; no transpose of x in the wrapper or kernel body.
    h = lax.dot_general(
        w1_ref[...], x, (((1,), (1,)), ((), ())),
        preferred_element_type=jnp.float32)                  # (HID, TB)
    h = jnp.maximum(h + b1_ref[...], 0.0)                    # bias + ReLU

    # fc2: plain (OUT, HID) @ (HID, TB) -> (OUT, TB), still lane-dense.
    y = jnp.dot(w2_ref[...], h, preferred_element_type=jnp.float32)
    o_ref[...] = (y + b2_ref[...]).astype(o_ref.dtype)


def neural_network_forward(x, w1, b1, w2, b2, *, tb_max=32768):
    """Forward pass matching the PyTorch module.

    x : (B, 10) float32                     (natural PyTorch layout, streamed as-is)
    w1: (5, 10), b1: (5,)   -- fc1.weight / fc1.bias (PyTorch layout)
    w2: (1, 5),  b2: (1,)   -- fc2.weight / fc2.bias
    returns: (B, 1) float32
    """
    B, in_dim = x.shape
    hid_dim = w1.shape[0]
    out_dim = w2.shape[0]

    x = x.astype(jnp.float32)
    w1 = w1.astype(jnp.float32)
    w2 = w2.astype(jnp.float32)
    b1c = b1.reshape(hid_dim, 1).astype(jnp.float32)
    b2c = b2.reshape(out_dim, 1).astype(jnp.float32)

    # --- Tile / grid selection -------------------------------------------
    tb_max = max(128, _round_up(tb_max, 128))     # always lane-aligned
    b_pad = _round_up(B, 128)                     # pad the *output* to lanes only
    # >= 2 grid steps whenever possible so ("parallel",) can shard the batch
    # axis across the two TensorCores on v7x.
    tb = min(tb_max, max(128, _round_up(_cdiv(b_pad, 2), 128)))
    assert tb % 128 == 0
    grid = _cdiv(b_pad, tb)                       # ragged last block is clipped

    # Tiny batches only (B < tb): pad x once so the single block is fully
    # in-bounds.  Large batches are streamed with NO pad/transpose pass.
    if B < tb:
        x = jnp.pad(x, ((0, tb - B), (0, 0)))

    # --- VMEM budget (explicit, so v5e's 16 MiB scoped default is raised) --
    # x block (tb, 10) f32 lane-pads to 128 lanes; output (1, tb) sublane-pads
    # to 8.  Both are double-buffered.  + headroom for resident weights and
    # Mosaic temporaries (transposed x feed, h, y: all lane-dense & small).
    x_window = 2 * tb * 128 * 4
    out_window = 2 * 8 * tb * 4
    vmem_limit = int(x_window + out_window + (8 << 20))      # ~42 MiB at tb=32768

    cost = pl.CostEstimate(
        flops=2 * B * (in_dim * hid_dim + hid_dim * out_dim),
        transcendentals=0,
        bytes_accessed=B * (in_dim + out_dim) * 4
        + (hid_dim * in_dim + hid_dim + out_dim * hid_dim + out_dim) * 4,
    )

    def resident(shape):
        # Same block for every grid step -> DMA'd once, stays in VMEM.
        return pl.BlockSpec(shape, lambda i: (0, 0))

    yT = pl.pallas_call(
        mlp_kernel,
        out_shape=jax.ShapeDtypeStruct((out_dim, b_pad), jnp.float32),
        grid=(grid,),
        in_specs=[
            pl.BlockSpec((tb, in_dim), lambda i: (i, 0)),     # x tiles, pipelined
            resident((hid_dim, in_dim)),
            resident((hid_dim, 1)),
            resident((out_dim, hid_dim)),
            resident((out_dim, 1)),
        ],
        out_specs=pl.BlockSpec((out_dim, tb), lambda i: (0, i)),
        compiler_params=pltpu.CompilerParams(
            dimension_semantics=("parallel",),                # megacore on v7x
            vmem_limit_bytes=vmem_limit,
        ),
        cost_estimate=cost,
    )(x, w1, b1c, w2, b2c)

    # (OUT, b_pad) -> (B, OUT).  With OUT == 1 this transpose is a free
    # degenerate-dim reshape; padded garbage columns are sliced off.
    return yT[:, :B].T


def reference_forward(x, w1, b1, w2, b2):
    h = jnp.maximum(x @ w1.T + b1, 0.0)
    return h @ w2.T + b2


if __name__ == "__main__":
    key = jax.random.PRNGKey(0)
    k_x, k_w1, k_b1, k_w2, k_b2 = jax.random.split(key, 5)

    batch = 8
    in_dim, hid_dim, out_dim = 10, 5, 1

    # Deterministic synthetic params in PyTorch nn.Linear layout:
    #   fc1.weight (5, 10), fc1.bias (5,), fc2.weight (1, 5), fc2.bias (1,)
    x = jax.random.normal(k_x, (batch, in_dim), dtype=jnp.float32)
    w1 = jax.random.normal(k_w1, (hid_dim, in_dim), dtype=jnp.float32) * 0.3
    b1 = jax.random.normal(k_b1, (hid_dim,), dtype=jnp.float32) * 0.1
    w2 = jax.random.normal(k_w2, (out_dim, hid_dim), dtype=jnp.float32) * 0.3
    b2 = jax.random.normal(k_b2, (out_dim,), dtype=jnp.float32) * 0.1

    out = jax.block_until_ready(neural_network_forward(x, w1, b1, w2, b2))
    ref = reference_forward(x, w1, b1, w2, b2)

    assert out.shape == (batch, out_dim), out.shape
    assert jnp.allclose(out, ref, atol=1e-5, rtol=1e-5), (out, ref)

    print("KERNEL_OK")
</pallas_src>

<mosaic_0001>
module attributes {stable_mosaic.version = 11 : i64} {
  func.func @mlp_kernel(%arg0: i32, %arg1: memref<128x10xf32, #tpu.memory_space<vmem>>, %arg2: memref<5x10xf32, #tpu.memory_space<vmem>>, %arg3: memref<5x1xf32, #tpu.memory_space<vmem>>, %arg4: memref<1x5xf32, #tpu.memory_space<vmem>>, %arg5: memref<1x1xf32, #tpu.memory_space<vmem>>, %arg6: memref<1x128xf32, #tpu.memory_space<vmem>>) attributes {dimension_semantics = [#tpu.dimension_semantics<parallel>], iteration_bounds = array<i64: 1>, scalar_prefetch = 0 : i64, scratch_operands = 0 : i64, tpu.core_type = #tpu.core_type<tc>, window_params = [{transform_indices = @transform_0, window_bounds = array<i64: 128, 10>}, {pipeline_mode = #tpu.pipeline_mode<synchronous>, transform_indices = @transform_1, window_bounds = array<i64: 5, 10>}, {pipeline_mode = #tpu.pipeline_mode<synchronous>, transform_indices = @transform_2, window_bounds = array<i64: 5, 1>}, {pipeline_mode = #tpu.pipeline_mode<synchronous>, transform_indices = @transform_3, window_bounds = array<i64: 1, 5>}, {pipeline_mode = #tpu.pipeline_mode<synchronous>, transform_indices = @transform_4, window_bounds = array<i64: 1, 1>}, {transform_indices = @transform_5, window_bounds = array<i64: 1, 128>}]} {
    %c0 = arith.constant 0 : index
    %c0_0 = arith.constant 0 : index
    %0 = vector.load %arg1[%c0, %c0_0] : memref<128x10xf32, #tpu.memory_space<vmem>>, vector<128x10xf32>
    %c0_1 = arith.constant 0 : index
    %c0_2 = arith.constant 0 : index
    %1 = vector.load %arg2[%c0_1, %c0_2] : memref<5x10xf32, #tpu.memory_space<vmem>>, vector<5x10xf32>
    %cst = arith.constant dense<0.000000e+00> : vector<5x128xf32>
    %2 = tpu.matmul %1, %0, %cst {dimension_numbers = #tpu.dot_dimension_numbers<[1], [1], [0], [0], [0, 0, 1, 0], [], []>} : vector<5x10xf32>, vector<128x10xf32>, vector<5x128xf32> -> vector<5x128xf32>
    %c0_3 = arith.constant 0 : index
    %c0_4 = arith.constant 0 : index
    %3 = vector.load %arg3[%c0_3, %c0_4] : memref<5x1xf32, #tpu.memory_space<vmem>>, vector<5x1xf32>
    %4 = vector.broadcast %3 : vector<5x1xf32> to vector<5x128xf32>
    %5 = arith.addf %2, %4 : vector<5x128xf32>
    %cst_5 = arith.constant 0.000000e+00 : f32
    %6 = vector.broadcast %cst_5 : f32 to vector<5x128xf32>
    %7 = arith.maximumf %5, %6 : vector<5x128xf32>
    %c0_6 = arith.constant 0 : index
    %c0_7 = arith.constant 0 : index
    %8 = vector.load %arg4[%c0_6, %c0_7] : memref<1x5xf32, #tpu.memory_space<vmem>>, vector<1x5xf32>
    %cst_8 = arith.constant dense<0.000000e+00> : vector<1x128xf32>
    %9 = tpu.matmul %8, %7, %cst_8 {dimension_numbers = #tpu.dot_dimension_numbers<[1], [0], [0], [1], [0, 0, 1, 1], [], []>} : vector<1x5xf32>, vector<5x128xf32>, vector<1x128xf32> -> vector<1x128xf32>
    %c0_9 = arith.constant 0 : index
    %c0_10 = arith.constant 0 : index
    %10 = vector.load %arg5[%c0_9, %c0_10] : memref<1x1xf32, #tpu.memory_space<vmem>>, vector<1x1xf32>
    %11 = vector.broadcast %10 : vector<1x1xf32> to vector<1x128xf32>
    %12 = arith.addf %9, %11 : vector<1x128xf32>
    %c0_11 = arith.constant 0 : index
    %c0_12 = arith.constant 0 : index
    %13 = vector.load %arg6[%c0_11, %c0_12] : memref<1x128xf32, #tpu.memory_space<vmem>>, vector<1x128xf32>
    tpu.vector_store %arg6[%c0_11, %c0_12], %12 {strides = array<i32>} : memref<1x128xf32, #tpu.memory_space<vmem>>, vector<1x128xf32>,
    return
  }
  func.func @transform_0(%arg0: i32) -> (i32, i32) {
    %c0_i32 = arith.constant 0 : i32
    %c0_i32_0 = arith.constant 0 : i32
    return %arg0, %c0_i32 : i32, i32
  }
  func.func @transform_1(%arg0: i32) -> (i32, i32) {
    %c0_i32 = arith.constant 0 : i32
    %c0_i32_0 = arith.constant 0 : i32
    %c0_i32_1 = arith.constant 0 : i32
    return %c0_i32, %c0_i32_0 : i32, i32
  }
  func.func @transform_2(%arg0: i32) -> (i32, i32) {
    %c0_i32 = arith.constant 0 : i32
    %c0_i32_0 = arith.constant 0 : i32
    %c0_i32_1 = arith.constant 0 : i32
    return %c0_i32, %c0_i32_0 : i32, i32
  }
  func.func @transform_3(%arg0: i32) -> (i32, i32) {
    %c0_i32 = arith.constant 0 : i32
    %c0_i32_0 = arith.constant 0 : i32
    %c0_i32_1 = arith.constant 0 : i32
    return %c0_i32, %c0_i32_0 : i32, i32
  }
  func.func @transform_4(%arg0: i32) -> (i32, i32) {
    %c0_i32 = arith.constant 0 : i32
    %c0_i32_0 = arith.constant 0 : i32
    %c0_i32_1 = arith.constant 0 : i32
    return %c0_i32, %c0_i32_0 : i32, i32
  }
  func.func @transform_5(%arg0: i32) -> (i32, i32) {
    %c0_i32 = arith.constant 0 : i32
    %c0_i32_0 = arith.constant 0 : i32
    return %c0_i32, %arg0 : i32, i32
  }
}

</mosaic_0001>

<bundles_post_ra>
// kernel: tpu_custom_call.1
= control target key start
LH: loop header
LB: loop body
LE: loop exit
PB: predicated region body
PF: predicated region fallthrough
CT: control target
= control target key end

     0   :  { %s543_s0 = inlined_call_operand.vmem [shape: f32[128,10], index: 0, kind: input, shape index: {}]   ;;  %s544_s1 = inlined_call_operand.vmem [shape: f32[5,10], index: 1, kind: input, shape index: {}]   ;;  %s545_s2 = inlined_call_operand.vmem [shape: f32[5,1], index: 2, kind: input, shape index: {}]   ;;  %s546_s3 = inlined_call_operand.vmem [shape: f32[1,5], index: 3, kind: input, shape index: {}]   ;;  %s547_s4 = inlined_call_operand.<no memory space> [shape: f32[1,1], index: 4, kind: input, shape index: {}]   ;;  %s548_s5 = inlined_call_operand.hbm [shape: f32[1,128], index: 5, kind: output, shape index: {}]  }
   0x1   :  { %v10_v0 = vstv %s547_s4 }
   0x2   :  { %11 = vst [vmem:[#allocation2] sm:$0x1] %v10_v0 }
   0x3   :  { %v23_v1 = vld [vmem:[%s543_s0] sm:$0xff]  ;;  %v24_v2 = vld [vmem:[%s543_s0 + $0x8] sm:$0xff]  ;;  %vm46_vm0 = vcmask 80896   ;;  %v413_v3 = vmov 0.0|0.0   ;;  %vm414_vm2 = vmmov 0   ;;  %v415_v6 = vmov 0.0  }
   0x4   :  { %351 = vmatprep.subr.bf16.mxu0 %v413_v3  ;;  %v352_v4 = vpack.c.bf16 %v24_v2, %v23_v1  ;;  %vm459_vm1 = vmpackc.low %vm46_vm0, %vm46_vm0  ;;  %343 = vmatprep.mubr.msk.f32.mxu0 %vm414_vm2, %v415_v6  ;;  %v416_v7 = vmov 0   ;;  %v25_v8 = vld [vmem:[%s543_s0 + $0x10] sm:$0xff]  ;;  %v26_v9 = vld [vmem:[%s543_s0 + $0x18] sm:$0xff] }
   0x5   :  { %388 = vset.pattern.permute.xlu0 %v416_v7  ;;  %346 = vmatprep.subr.mxu1 %v415_v6  ;;  %v40_v10 = vld [vmem:[%s545_s2] sm:$0x1f] }
   0x6   :  { %354 = vmatpush3.bf16.xpose.msk.msra.mxu0 %vm459_vm1, %v352_v4  ;;  %348 = vmatprep.mubr.msk.f32.mxu1 %vm414_vm2, %v415_v6 }
   0x7   :  { %355 = vmatprep.subr.bf16.mxu0 %v413_v3 }
   0x8   :  { %12 = vsyncpa [#allocation4], 0  ;;  %v356_v11 = vpack.c.bf16 %v26_v9, %v25_v8  ;;  %43 = vperm.xlu0 %388, %v40_v10   ;;  %v27_v13 = vld [vmem:[%s543_s0 + $0x20] sm:$0xff]  ;;  %v28_v14 = vld [vmem:[%s543_s0 + $0x28] sm:$0xff]  ;;  %vm184_vm3 = vcmask 1044480   ;;  %vm180_vm4 = vcmask 39936   ;;  %v176_v38 = vlaneseq }
   0x9   :  { %v170_v12 = vld [vmem:[#allocation2] sm:$0x1]  ;;  %v360_v15 = vpack.c.bf16 %v28_v14, %v27_v13  ;;  %v29_v16 = vld [vmem:[%s543_s0 + $0x30] sm:$0xff]  ;;  %v30_v17 = vld [vmem:[%s543_s0 + $0x38] sm:$0xff] }
   0xa   :  { %v364_v18 = vpack.c.bf16 %v30_v17, %v29_v16  ;;  %v31_v19 = vld [vmem:[%s543_s0 + $0x40] sm:$0xff]  ;;  %v32_v20 = vld [vmem:[%s543_s0 + $0x48] sm:$0xff]  ;;  %v33_v22 = vld [vmem:[%s543_s0 + $0x50] sm:$0xff]  ;;  %v177_v39 = vshrl.u32 %v176_v38, 7 }
   0xb   :  { %v368_v21 = vpack.c.bf16 %v32_v20, %v31_v19  ;;  %v34_v23 = vld [vmem:[%s543_s0 + $0x58] sm:$0xff]  ;;  %v35_v25 = vld [vmem:[%s543_s0 + $0x60] sm:$0xff]  ;;  %v36_v26 = vld [vmem:[%s543_s0 + $0x68] sm:$0xff] }
   0xc   :  { %173 = vperm.xlu0 %388, %v170_v12   ;;  %v372_v24 = vpack.c.bf16 %v34_v23, %v33_v22  ;;  %v376_v27 = vpack.c.bf16 %v36_v26, %v35_v25  ;;  %v37_v28 = vld [vmem:[%s543_s0 + $0x70] sm:$0xff]  ;;  %v38_v29 = vld [vmem:[%s543_s0 + $0x78] sm:$0xff]  ;;  %v39_v31 = vld [vmem:[%s544_s1] sm:$0x1f]  ;;  %v178_v40 = vsub.s32 0, %v177_v39  ;;  %s417_s0 = smov [#allocation3]  }
   0xd   :  { %v380_v30 = vpack.c.bf16 %v38_v29, %v37_v28  ;;  %v169_v37 = vld [vmem:[%s546_s3] sm:$0x1]  ;;  %s265_s1 = sshll.u32 %s417_s0, 4  ;;  %s266_s1 = int_to_ptr.vmem [resolvable:$true] %s265_s1 }
   0xe   :  { %358 = vmatpush3.bf16.xpose.msk.msra.mxu0 %vm459_vm1, %v356_v11  ;;  %s389_s30 = scalar_lea.vmem %s266_s1, 16  ;;  %s393_s6 = scalar_lea.vmem %s266_s1, 32 }
   0xf   :  { %359 = vmatprep.subr.bf16.mxu0 %v413_v3  ;;  %p390_p0 = scmp.ne.s32.totalorder %s266_s1, %s389_s30  ;;  %p394_p1 = scmp.lt.s32.totalorder %s266_s1, %s266_s1 }
  0x10   :  { %p395_p2 = scmp.lt.s32.totalorder %s393_s6, %s389_s30 }
  0x12   :  { %p396_p3 = por %p395_p2, %p394_p1 }
  0x14   :  { %p397_p4 = pnand %p396_p3, %p390_p0 }
  0x16   :  { %362 = vmatpush3.bf16.xpose.msk.msra.mxu0 %vm459_vm1, %v360_v15 }
  0x17   :  { %363 = vmatprep.subr.bf16.mxu0 %v413_v3 }
  0x1e   :  { %366 = vmatpush3.bf16.xpose.msk.msra.mxu0 %vm459_vm1, %v364_v18 }
  0x1f   :  { %367 = vmatprep.subr.bf16.mxu0 %v413_v3 }
  0x26   :  { %370 = vmatpush3.bf16.xpose.msk.msra.mxu0 %vm459_vm1, %v368_v21 }
  0x27   :  { %371 = vmatprep.subr.bf16.mxu0 %v413_v3 }
  0x2e   :  { %374 = vmatpush3.bf16.xpose.msk.msra.mxu0 %vm459_vm1, %v372_v24 }
  0x2f   :  { %375 = vmatprep.subr.bf16.mxu0 %v413_v3 }
  0x36   :  { %378 = vmatpush3.bf16.xpose.msk.msra.mxu0 %vm459_vm1, %v376_v27 }
  0x37   :  { %379 = vmatprep.subr.bf16.mxu0 %v413_v3 }
  0x3e   :  { %382 = vmatpush3.bf16.xpose.msk.msra.mxu0 %vm459_vm1, %v380_v30 }
  0x45   :  { %344 = vmatmul.mubr.msk.f32.vlgmr.msra.gmra.mrb[0].mxu0 %vm46_vm0, %v39_v31 }
  0x87   :  { %v44_v32 = vpop.permute.xlu0 %43 }
  0x8b   :  { %v174_v41 = vpop.permute.xlu0 %173 }
  0x8c   :  { %v179_v42 = vrot.slane %v174_v41, %v178_v40 }
 0x118   :  { %v164_v33 = vpop.f32.mrb[0].mxu0 }
 0x119   :  { %v165_v34 = vadd.f32 %v164_v33, %v44_v32  ;;  %v345_v35 = vpop.f32.mrb[1].mxu0 }
 0x11b   :  { %v168_v36 = vmax.f32 %v165_v34, 0.0 }
 0x11d   :  { %347 = vmatpush3.msk.msra.mxu1 %vm184_vm3, %v168_v36 }
 0x11e   :  { %349 = vmatmul.mubr.msk.f32.vlgmr.msra.gmra.mrb[0].mxu1 %vm180_vm4, %v169_v37 }
 0x1f1   :  { %v254_v43 = vpop.f32.mrb[0].mxu1 }
 0x1f2   :  { %v255_v44 = vadd.f32 %v254_v43, %v179_v42  ;;  %v350_v45 = vpop.f32.mrb[1].mxu1 }
 0x1f4   :  { %258 = vst [vmem:[#allocation3] sm:$0x1] %v255_v44 }
 0x1f5   :  { %400 = shalt.err (!%p397_p4)
}
 0x1f6   :  { %s401_s2 = scalar_lea.hbm %s548_s5, 16 }
 0x1f7   :  { %p402_p5 = scmp.ne.s32.totalorder %s548_s5, %s401_s2  ;;  %p405_p6 = scmp.lt.u32.totalorder %s401_s2, %s548_s5 }
 0x1f9   :  { %p407_p7 = pnand %p405_p6, %p402_p5 }
 0x1fb   :  { %410 = shalt.err (!%p407_p7)
}
 0x1fc   :  { %268 = dma.vmem_to_hbm [thread:$0]  %s266_s1, 16, %s548_s5, [#allocation4]  }
 0x1fd   :  { %411 = dma.done.wait [#allocation4], 16  }
 0x1fe   :  { %412 = vsyncadd [#allocation4], 4294967280 }
 0x1ff   :  { %272 = vsyncpa [#allocation4], 1 }

</bundles_post_ra>
